<compile_context>
chip_gen: v7x
topology: tpu7x:2x2x1
jax: 0.10.0
libtpu: 0.0.40
codegen_flags: <defaults>
</compile_context>

<pallas_src>
import math

import jax
import jax.numpy as jnp
from jax.experimental import pallas as pl
from jax.experimental.pallas import tpu as pltpu


def _mhca_kernel(xy_ref, bias_ref, w3_ref, wo_ref, bo_ref, o_ref):
    # Static shape bookkeeping (Python ints at trace time).
    _, S_tgt, S_src, _ = bias_ref.shape
    H = wo_ref.shape[0]
    heads = w3_ref.shape[1] - 2 * H          # == H for this module's shapes to compose

    xy = xy_ref[0]                           # (S_src + S_tgt, H)   [x rows first, then y rows]
    bias = bias_ref[0]                       # (S_tgt, S_src, 1)    additive mask: 0 or -1e9

    # --- Fused projections: one MXU pass  [x; y] @ [Wk | Wv | Wq] ------------------------------
    kvq = jnp.dot(xy, w3_ref[...], preferred_element_type=jnp.float32)   # (S_src+S_tgt, 2H+heads)
    k = kvq[:S_src, 0:H]                     # (S_src, H)       = x @ Wk
    v = kvq[:S_src, H:H + heads]             # (S_src, heads==H) = x @ Wv
    q = kvq[S_src:, H + heads:]              # (S_tgt, H)       = y @ Wq

    # --- Attention core (head_dim == 1): scores[i, j, h] = q[i, h] * k[j, h] -------------------
    # Layout (S_tgt, S_src, H): H on lanes, S_src on sublanes -> no transposes, sublane reduces.
    scores = q[:, None, :] * k[None, :, :] + bias            # (S_tgt, S_src, H)
    m = jnp.max(scores, axis=1, keepdims=True)                # (S_tgt, 1, H)
    p = jnp.exp(scores - m)                                   # (S_tgt, S_src, H)
    l = jnp.sum(p, axis=1)                                    # (S_tgt, H)
    ctx = jnp.sum(p * v[None, :, :], axis=1)                  # (S_tgt, H)  unnormalised
    ctx = ctx * pl.reciprocal(l, approx=True)                 # normalise once (EUP reciprocal)

    # --- Output projection (with bias) ---------------------------------------------------------
    out = jnp.dot(ctx, wo_ref[...], preferred_element_type=jnp.float32) + bo_ref[...]
    o_ref[0] = out.astype(o_ref.dtype)


def multi_head_cross_attention(x, y, mask, params):
    B, S_src, H = x.shape
    _, S_tgt, _ = y.shape
    heads = params["wv"].shape[0]
    assert heads == H, "original module's value path only composes when hidden_units == heads"
    S_all = S_src + S_tgt

    # Wrapper-side glue (cheap XLA ops):
    #  * stack x and y so the kernel does a single fused projection matmul
    #  * pre-transpose / concatenate weights to (in, out) and [Wk | Wv | Wq]
    #  * additive mask with a trailing singleton dim (lane-broadcast inside the kernel)
    xy = jnp.concatenate([x, y], axis=1)                                   # (B, S_all, H)
    bias = ((mask - 1.0) * 1e9)[..., None]                                 # (B, S_tgt, S_src, 1)
    w3 = jnp.concatenate(
        [params["wk"].T, params["wv"].T, params["wq"].T], axis=1)          # (H, 2H + heads)
    wo_t = params["wo"].T                                                  # (H, H)
    bo = params["bo"].reshape(1, H)                                        # (1, H)

    return pl.pallas_call(
        _mhca_kernel,
        out_shape=jax.ShapeDtypeStruct((B, S_tgt, H), jnp.float32),
        grid_spec=pltpu.PrefetchScalarGridSpec(
            num_scalar_prefetch=0,
            grid=(B,),  # one batch element per grid step; both v7x TCs busy when B >= 2
            in_specs=[
                pl.BlockSpec((1, S_all, H), lambda b: (b, 0, 0)),
                pl.BlockSpec((1, S_tgt, S_src, 1), lambda b: (b, 0, 0, 0)),
                pl.BlockSpec((H, 2 * H + heads), lambda b: (0, 0)),   # constant index_map:
                pl.BlockSpec((H, H), lambda b: (0, 0)),               #   DMA'd once, reused
                pl.BlockSpec((1, H), lambda b: (0, 0)),
            ],
            out_specs=pl.BlockSpec((1, S_tgt, H), lambda b: (b, 0, 0)),
        ),
        compiler_params=pltpu.CompilerParams(dimension_semantics=("parallel",)),
    )(xy, bias, w3, wo_t, bo)


def reference(x, y, mask, params):
    """Pure-JAX mirror of the PyTorch forward (for verification)."""
    B, S_src, H = x.shape
    heads = params["wv"].shape[0]
    hd = H // heads
    k = x @ params["wk"].T
    v = x @ params["wv"].T
    q = y @ params["wq"].T
    k = k.reshape(B, -1, heads, hd).transpose(0, 2, 1, 3)
    v = v.reshape(B, -1, heads, hd).transpose(0, 2, 1, 3)
    q = q.reshape(B, -1, heads, hd).transpose(0, 2, 1, 3)
    scores = jnp.einsum("bhqd,bhkd->bhqk", q, k) / math.sqrt(hd)
    scores = jnp.where(mask[:, None, :, :] == 0.0, -1e9, scores)
    attn = jax.nn.softmax(scores, axis=-1)
    ctx = jnp.einsum("bhqk,bhkd->bhqd", attn, v)
    ctx = ctx.transpose(0, 2, 1, 3).reshape(B, -1, heads * hd)
    return ctx @ params["wo"].T + params["bo"]


if __name__ == "__main__":
    B, S_src, S_tgt = 2, 16, 8
    hidden_units = 32
    heads = 32  # hidden_units == heads required for the original module's shapes to compose

    key = jax.random.PRNGKey(0)
    kx, ky, kwk, kwq, kwv, kwo, kbo = jax.random.split(key, 7)

    x = jax.random.normal(kx, (B, S_src, hidden_units), jnp.float32)
    y = jax.random.normal(ky, (B, S_tgt, hidden_units), jnp.float32)

    # deterministic padding mask: batch 0 attends to all 16 source tokens, batch 1 to the first 10
    lengths = jnp.array([16, 10], jnp.int32)
    mask = (jnp.arange(S_src)[None, None, :] < lengths[:, None, None]).astype(jnp.float32)
    mask = jnp.broadcast_to(mask, (B, S_tgt, S_src))

    s = 1.0 / math.sqrt(hidden_units)
    params = {
        "wk": jax.random.uniform(kwk, (hidden_units, hidden_units), jnp.float32, -s, s),
        "wq": jax.random.uniform(kwq, (hidden_units, hidden_units), jnp.float32, -s, s),
        "wv": jax.random.uniform(kwv, (heads, hidden_units), jnp.float32, -s, s),
        "wo": jax.random.uniform(kwo, (hidden_units, hidden_units), jnp.float32, -s, s),
        "bo": jax.random.uniform(kbo, (hidden_units,), jnp.float32, -s, s),
    }

    out = multi_head_cross_attention(x, y, mask, params)
    out = jax.block_until_ready(out)

    ref = reference(x, y, mask, params)
    assert out.shape == (B, S_tgt, hidden_units)
    # tolerance 5e-3: pl.reciprocal(approx=True) uses the EUP's approximate reciprocal
    assert jnp.allclose(out, ref, atol=5e-3, rtol=5e-3), float(jnp.max(jnp.abs(out - ref)))

    print("KERNEL_OK")
</pallas_src>

<mosaic_0001>
module attributes {stable_mosaic.version = 11 : i64} {
  func.func @_mhca_kernel(%arg0: i32, %arg1: memref<1x24x32xf32, #tpu.memory_space<vmem>>, %arg2: memref<1x8x16x1xf32, #tpu.memory_space<vmem>>, %arg3: memref<32x96xf32, #tpu.memory_space<vmem>>, %arg4: memref<32x32xf32, #tpu.memory_space<vmem>>, %arg5: memref<1x32xf32, #tpu.memory_space<vmem>>, %arg6: memref<1x8x32xf32, #tpu.memory_space<vmem>>) attributes {dimension_semantics = [#tpu.dimension_semantics<parallel>], iteration_bounds = array<i64: 2>, scalar_prefetch = 0 : i64, scratch_operands = 0 : i64, tpu.core_type = #tpu.core_type<tc>, window_params = [{transform_indices = @transform_0, window_bounds = array<i64: 1, 24, 32>}, {transform_indices = @transform_1, window_bounds = array<i64: 1, 8, 16, 1>}, {pipeline_mode = #tpu.pipeline_mode<synchronous>, transform_indices = @transform_2, window_bounds = array<i64: 32, 96>}, {pipeline_mode = #tpu.pipeline_mode<synchronous>, transform_indices = @transform_3, window_bounds = array<i64: 32, 32>}, {pipeline_mode = #tpu.pipeline_mode<synchronous>, transform_indices = @transform_4, window_bounds = array<i64: 1, 32>}, {transform_indices = @transform_5, window_bounds = array<i64: 1, 8, 32>}]} {
    %c0 = arith.constant 0 : index
    %c0_0 = arith.constant 0 : index
    %c0_1 = arith.constant 0 : index
    %0 = vector.load %arg1[%c0, %c0_0, %c0_1] : memref<1x24x32xf32, #tpu.memory_space<vmem>>, vector<1x24x32xf32>
    %1 = vector.shape_cast %0 : vector<1x24x32xf32> to vector<24x32xf32>
    %c0_2 = arith.constant 0 : index
    %c0_3 = arith.constant 0 : index
    %c0_4 = arith.constant 0 : index
    %c0_5 = arith.constant 0 : index
    %2 = vector.load %arg2[%c0_2, %c0_3, %c0_4, %c0_5] : memref<1x8x16x1xf32, #tpu.memory_space<vmem>>, vector<1x8x16x1xf32>
    %3 = vector.shape_cast %2 : vector<1x8x16x1xf32> to vector<8x16x1xf32>
    %c0_6 = arith.constant 0 : index
    %c0_7 = arith.constant 0 : index
    %4 = vector.load %arg3[%c0_6, %c0_7] : memref<32x96xf32, #tpu.memory_space<vmem>>, vector<32x96xf32>
    %cst = arith.constant dense<0.000000e+00> : vector<24x96xf32>
    %5 = tpu.matmul %1, %4, %cst {dimension_numbers = #tpu.dot_dimension_numbers<[1], [0], [0], [1], [0, 0, 1, 1], [], []>} : vector<24x32xf32>, vector<32x96xf32>, vector<24x96xf32> -> vector<24x96xf32>
    %6 = vector.extract_strided_slice %5 {offsets = [0, 0], sizes = [16, 32], strides = [1, 1]} : vector<24x96xf32> to vector<16x32xf32>
    %7 = vector.extract_strided_slice %5 {offsets = [0, 32], sizes = [16, 32], strides = [1, 1]} : vector<24x96xf32> to vector<16x32xf32>
    %8 = vector.extract_strided_slice %5 {offsets = [16, 64], sizes = [8, 32], strides = [1, 1]} : vector<24x96xf32> to vector<8x32xf32>
    %9 = vector.shape_cast %8 : vector<8x32xf32> to vector<8x1x32xf32>
    %10 = vector.shape_cast %6 : vector<16x32xf32> to vector<1x16x32xf32>
    %11 = vector.broadcast %9 : vector<8x1x32xf32> to vector<8x16x32xf32>
    %12 = vector.broadcast %10 : vector<1x16x32xf32> to vector<8x16x32xf32>
    %13 = arith.mulf %11, %12 : vector<8x16x32xf32>
    %14 = vector.broadcast %3 : vector<8x16x1xf32> to vector<8x16x32xf32>
    %15 = arith.addf %13, %14 : vector<8x16x32xf32>
    %cst_8 = arith.constant dense<0xFF800000> : vector<8x32xf32>
    %16 = vector.multi_reduction <maximumf>, %15, %cst_8 [1] : vector<8x16x32xf32> to vector<8x32xf32>
    %17 = vector.shape_cast %16 : vector<8x32xf32> to vector<8x1x32xf32>
    %18 = vector.broadcast %17 : vector<8x1x32xf32> to vector<8x16x32xf32>
    %19 = arith.subf %15, %18 : vector<8x16x32xf32>
    %20 = math.exp %19 : vector<8x16x32xf32>
    %cst_9 = arith.constant dense<0.000000e+00> : vector<8x32xf32>
    %21 = vector.multi_reduction <add>, %20, %cst_9 [1] : vector<8x16x32xf32> to vector<8x32xf32>
    %22 = vector.shape_cast %7 : vector<16x32xf32> to vector<1x16x32xf32>
    %23 = vector.broadcast %22 : vector<1x16x32xf32> to vector<8x16x32xf32>
    %24 = arith.mulf %20, %23 : vector<8x16x32xf32>
    %cst_10 = arith.constant dense<0.000000e+00> : vector<8x32xf32>
    %25 = vector.multi_reduction <add>, %24, %cst_10 [1] : vector<8x16x32xf32> to vector<8x32xf32>
    %26 = tpu.reciprocal %21 {approx = true} : vector<8x32xf32> -> vector<8x32xf32>
    %27 = arith.mulf %25, %26 : vector<8x32xf32>
    %c0_11 = arith.constant 0 : index
    %c0_12 = arith.constant 0 : index
    %28 = vector.load %arg4[%c0_11, %c0_12] : memref<32x32xf32, #tpu.memory_space<vmem>>, vector<32x32xf32>
    %cst_13 = arith.constant dense<0.000000e+00> : vector<8x32xf32>
    %29 = tpu.matmul %27, %28, %cst_13 {dimension_numbers = #tpu.dot_dimension_numbers<[1], [0], [0], [1], [0, 0, 1, 1], [], []>} : vector<8x32xf32>, vector<32x32xf32>, vector<8x32xf32> -> vector<8x32xf32>
    %c0_14 = arith.constant 0 : index
    %c0_15 = arith.constant 0 : index
    %30 = vector.load %arg5[%c0_14, %c0_15] : memref<1x32xf32, #tpu.memory_space<vmem>>, vector<1x32xf32>
    %31 = vector.broadcast %30 : vector<1x32xf32> to vector<8x32xf32>
    %32 = arith.addf %29, %31 : vector<8x32xf32>
    %c0_16 = arith.constant 0 : index
    %c0_17 = arith.constant 0 : index
    %c0_18 = arith.constant 0 : index
    %33 = vector.load %arg6[%c0_16, %c0_17, %c0_18] : memref<1x8x32xf32, #tpu.memory_space<vmem>>, vector<1x8x32xf32>
    %34 = vector.shape_cast %33 : vector<1x8x32xf32> to vector<8x32xf32>
    %35 = vector.shape_cast %32 : vector<8x32xf32> to vector<1x8x32xf32>
    tpu.vector_store %arg6[%c0_16, %c0_17, %c0_18], %35 {strides = array<i32>} : memref<1x8x32xf32, #tpu.memory_space<vmem>>, vector<1x8x32xf32>,
    return
  }
  func.func @transform_0(%arg0: i32) -> (i32, i32, i32) {
    %c0_i32 = arith.constant 0 : i32
    %c0_i32_0 = arith.constant 0 : i32
    %c0_i32_1 = arith.constant 0 : i32
    return %arg0, %c0_i32, %c0_i32_0 : i32, i32, i32
  }
  func.func @transform_1(%arg0: i32) -> (i32, i32, i32, i32) {
    %c0_i32 = arith.constant 0 : i32
    %c0_i32_0 = arith.constant 0 : i32
    %c0_i32_1 = arith.constant 0 : i32
    %c0_i32_2 = arith.constant 0 : i32
    return %arg0, %c0_i32, %c0_i32_0, %c0_i32_1 : i32, i32, i32, i32
  }
  func.func @transform_2(%arg0: i32) -> (i32, i32) {
    %c0_i32 = arith.constant 0 : i32
    %c0_i32_0 = arith.constant 0 : i32
    %c0_i32_1 = arith.constant 0 : i32
    return %c0_i32, %c0_i32_0 : i32, i32
  }
  func.func @transform_3(%arg0: i32) -> (i32, i32) {
    %c0_i32 = arith.constant 0 : i32
    %c0_i32_0 = arith.constant 0 : i32
    %c0_i32_1 = arith.constant 0 : i32
    return %c0_i32, %c0_i32_0 : i32, i32
  }
  func.func @transform_4(%arg0: i32) -> (i32, i32) {
    %c0_i32 = arith.constant 0 : i32
    %c0_i32_0 = arith.constant 0 : i32
    %c0_i32_1 = arith.constant 0 : i32
    return %c0_i32, %c0_i32_0 : i32, i32
  }
  func.func @transform_5(%arg0: i32) -> (i32, i32, i32) {
    %c0_i32 = arith.constant 0 : i32
    %c0_i32_0 = arith.constant 0 : i32
    %c0_i32_1 = arith.constant 0 : i32
    return %arg0, %c0_i32, %c0_i32_0 : i32, i32, i32
  }
}

</mosaic_0001>

<bundles_post_ra>
// kernel: tpu_custom_call.1
= control target key start
LH: loop header
LB: loop body
LE: loop exit
PB: predicated region body
PF: predicated region fallthrough
CT: control target
= control target key end

     0   :  { %10 = vsyncpa [#allocation3], 0  ;;  %s1690_s0 = inlined_call_operand.vmem [shape: f32[2,24,32], index: 0, kind: input, shape index: {}]   ;;  %s1691_s1 = inlined_call_operand.vmem [shape: f32[2,8,16,1], index: 1, kind: input, shape index: {}]   ;;  %s1692_s2 = inlined_call_operand.vmem [shape: f32[32,96], index: 2, kind: input, shape index: {}]   ;;  %s1693_s3 = inlined_call_operand.vmem [shape: f32[32,32], index: 3, kind: input, shape index: {}]   ;;  %s1694_s4 = inlined_call_operand.vmem [shape: f32[1,32], index: 4, kind: input, shape index: {}]   ;;  %s1695_s5 = inlined_call_operand.hbm [shape: f32[2,8,32], index: 5, kind: output, shape index: {}]  }
   0x1   :  { %12 = vsyncpa [#allocation3 + $0x1], 0  ;;  %s1331_s18 = smov 0   ;;  %s1333_s19 = smov 0  }
   0x2   :  { %s1335_s20 = smov 0   ;;  %s1337_s21 = smov 0  }
   0x3 LB: > { %s1352_s22 = sadd.s32 4294967295, %s1291_s21   ;;  %s1062_s23 = sadd.s32 4294967294, %s1291_s21   ;;  %s1291_s21 = sphi %s1337_s21, %s1701_s21   ;;  %s1287_s20 = sphi %s1335_s20, %s1700_s20   ;;  %s1283_s19 = sphi %s1333_s19, %s1699_s19   ;;  %s1279_s18 = sphi %s1331_s18, %s1698_s18  }
   0x4   : > { %s1356_s24 = sadd.s32 1, %s1291_s21   ;;  %s140_s25 = sadd.s32 1, %s1287_s20 }
   0x5   : > { %s137_s26 = ssub.s32 %s1291_s21, %s1356_s24  ;;  %p150_p0 = scmp.ne.s32.totalorder %s1287_s20, %s1283_s19 }
   0x6   : > { %p138_p1 = scmp.eq.s32.totalorder %s137_s26, 0  ;;  %p151_p2 = scmp.eq.s32.totalorder %s1352_s22, 1 }
   0x7   : > { %p156_p3 = scmp.ne.s32.totalorder %s1283_s19, %s1279_s18  ;;  %p157_p4 = scmp.eq.s32.totalorder %s1062_s23, 1 }
   0x8   : > { %s1367_s27 = scalar_select %p138_p1, %s1287_s20, %s140_s25  }
   0x9   : > { %p1369_p5 = por %p151_p2, %p150_p0  ;;  %p1373_p6 = por %p157_p4, %p156_p3 }
   0xa   : > { %p1065_p7 = scmp.ge.s32.totalorder %s1291_s21, 1  ;;  %p200_p8 = scmp.lt.s32.totalorder %s1291_s21, 3 }
   0xc   : > { %p201_p9 = pnand %p1065_p7, %p200_p8 }
   0xd   : > { %v262_v0 = vld [vmem:[%s1692_s2] sm:$0xff] (!%p201_p9)  ;;  %v263_v1 = vld [vmem:[%s1692_s2 + $0x8] sm:$0xff] (!%p201_p9)  ;;  %v264_v2 = vld [vmem:[%s1692_s2 + $0x10] sm:$0xff] (!%p201_p9)  ;;  %v1293_v3 = vmov (!%p201_p9), 0.0|0.0   ;;  %vm1294_vm0 = vmmov (!%p201_p9), 0   ;;  %v1295_v6 = vmov (!%p201_p9), 0.0   ;;  %v361_v39 = vlaneseq (!%p201_p9) }
   0xe   : > { %204 = sbr.rel (%p201_p9) target bundleno = 792 (0x318), region = 40  ;;  %1120 = vmatprep.subr.bf16.mxu0 (!%p201_p9), %v1293_v3  ;;  %v1121_v4 = vpack.c.bf16 (!%p201_p9), %v263_v1, %v262_v0  ;;  %v265_v5 = vld [vmem:[%s1692_s2 + $0x18] sm:$0xff] (!%p201_p9)  ;;  %1100 = vmatprep.mubr.msk.f32.mxu0 (!%p201_p9), %vm1294_vm0, %v1295_v6  ;;  %p233_p10 = scmp.lt.s32.totalorder (!%p201_p9), %s1352_s22, 1  ;;  %v1296_v7 = vmov (!%p201_p9), 0   ;;  %vm266_vm1 = vcmask (!%p201_p9), 261120   ;;  %v869_v44 = vld [vmem:[%s1693_s3] sm:$0xff] (!%p201_p9) }
   0xf   : > { %1180 = vset.pattern.permute.xlu1 (!%p201_p9), %v1296_v7  ;;  %1179 = vset.pattern.permute.xlu0 (!%p201_p9), %v1296_v7  ;;  %v1124_v8 = vpack.c.bf16 (!%p201_p9), %v265_v5, %v264_v2  ;;  %s1297_s6 = smov (!%p201_p9), 64   ;;  %s1298_s7 = smov (!%p201_p9), 32   ;;  %v1299_v37 = vmov (!%p201_p9), 1966171168   ;;  %v362_v43 = vshrl.u32 (!%p201_p9), %v361_v39, 7  ;;  %v870_v45 = vld [vmem:[%s1693_s3 + $0x8] sm:$0xff] (!%p201_p9) }
  0x10   : > { %1122 = vmatpush3.bf16.msra.mxu0 (!%p201_p9), %v1121_v4  ;;  %1126 = vmatprep.subr.bf16.mxu1 (!%p201_p9), %v1293_v3  ;;  %v359_v38 = vunpack.c.l.s4 (!%p201_p9), %v1299_v37  ;;  %v871_v46 = vld [vmem:[%s1693_s3 + $0x10] sm:$0xff] (!%p201_p9)  ;;  %v1127_v47 = vpack.c.bf16 (!%p201_p9), %v870_v45, %v869_v44  ;;  %v872_v48 = vld [vmem:[%s1693_s3 + $0x18] sm:$0xff] (!%p201_p9)  ;;  %vm566_vm2 = vcmask (!%p201_p9), 785920   ;;  %vm888_vm3 = vcmask (!%p201_p9), 1041409   ;;  %s230_s16 = sand.u32 (!%p201_p9), 1, %s1283_s19   ;;  %s1076_s26 = sshll.u32 (!%p201_p9), %s1352_s22, 7 }
  0x11   : > { %1123 = vmatprep.subr.bf16.mxu0 (!%p201_p9), %v1293_v3  ;;  %1117 = vmatprep.mubr.msk.f32.mxu1 (!%p201_p9), %vm1294_vm0, %v1295_v6  ;;  %v1130_v50 = vpack.c.bf16 (!%p201_p9), %v872_v48, %v871_v46  ;;  %v1448_v4 = vsub.s32 (!%p201_p9), 0, %v362_v43  ;;  %vm890_vm4 = vcmask (!%p201_p9), 1042434   ;;  %vm892_vm5 = vcmask (!%p201_p9), 1043459   ;;  %s1066_s17 = sshll.u32 (!%p201_p9), %s230_s16, 3  ;;  %s978_s10 = scalar_lea.sflag (!%p201_p9), [#allocation3], %s230_s16 }
  0x12   : > { %v360_v42 = vunpack.c.0.s8 (!%p201_p9), %v359_v38  ;;  %1128 = vmatpush3.bf16.msra.mxu1 (!%p201_p9), %v1127_v47  ;;  %vm894_vm6 = vcmask (!%p201_p9), 1044484   ;;  %vm896_vm7 = vcmask (!%p201_p9), 1045509   ;;  %vm898_vm8 = vcmask (!%p201_p9), 1046534  }
  0x13   : > { %1129 = vmatprep.subr.bf16.mxu1 (!%p201_p9), %v1293_v3  ;;  %vm900_vm9 = vcmask (!%p201_p9), 1047559  }
  0x14   : > { %1125 = vmatpush3.bf16.msra.mxu0 (!%p201_p9), %v1124_v8  ;;  %v363_v51 = vsub.s32 (!%p201_p9), %v360_v42, %v362_v43 }
  0x15   : > { %s234_s13 = scalar_select %p233_p10, %s1352_s22, 1 }
  0x16   : > { %1131 = vmatpush3.bf16.msra.mxu1 %v1130_v50  ;;  %s1300_s22 = smov [#allocation2]  }
  0x17   : > { %s1132_s14 = smul.u32 24, %s234_s13  ;;  %s1079_s15 = sshll.u32 %s234_s13, 7 }
  0x18   : > { %s1401_s23 = scalar_lea.vmem %s1691_s1, %s1079_s15  ;;  %s1233_s12 = sshll.u32 %s1300_s22, 4  ;;  %s1234_s12 = int_to_ptr.vmem [resolvable:$false] %s1233_s12 }
  0x19   : > { %s237_s30 = scalar_lea.vmem %s1690_s0, %s1132_s14  ;;  %v248_v9 = vld [vmem:[%s1401_s23 + $0x10] sm:$0xff]  ;;  %v246_v10 = vld [vmem:[%s1401_s23] sm:$0xff]  ;;  %v249_v12 = vld [vmem:[%s1401_s23 + $0x18] sm:$0xff]  ;;  %s1235_s13 = scalar_lea.vmem %s1234_s12, 256 }
  0x1a   : > { %v243_v11 = vld [vmem:[%s237_s30] sm:$0xff]  ;;  %482 = vperm.xlu1 %1180, %v248_v9   ;;  %472 = vperm.xlu0 %1179, %v246_v10   ;;  %v247_v13 = vld [vmem:[%s1401_s23 + $0x8] sm:$0xff]  ;;  %v245_v17 = vld [vmem:[%s237_s30 + $0x10] sm:$0xff] }
  0x1b   : > { %1101 = vmatmul.mubr.msk.f32.vlgmr.msra.gmra.mrb[0].mxu0 %vm266_vm1, %v243_v11  ;;  %v244_v14 = vld [vmem:[%s237_s30 + $0x8] sm:$0xff]  ;;  %v250_v16 = vld [vmem:[%s1401_s23 + $0x20] sm:$0xff]  ;;  %v253_v18 = vld [vmem:[%s1401_s23 + $0x38] sm:$0xff]  ;;  %s232_s30 = scalar_lea.vmem [#allocation2], %s1066_s17 }
  0x1c   : > { %1103 = vmatprep.mubr.msk.f32.mxu0 %vm1294_vm0, %v1295_v6  ;;  %v251_v15 = vld [vmem:[%s1401_s23 + $0x28] sm:$0xff]  ;;  %v252_v19 = vld [vmem:[%s1401_s23 + $0x30] sm:$0xff]  ;;  %v254_v21 = vld [vmem:[%s1401_s23 + $0x40] sm:$0xff] }
  0x1d   : > { %v255_v20 = vld [vmem:[%s1401_s23 + $0x48] sm:$0xff]  ;;  %v257_v22 = vld [vmem:[%s1401_s23 + $0x58] sm:$0xff]  ;;  %v256_v23 = vld [vmem:[%s1401_s23 + $0x50] sm:$0xff] }
  0x1e   : > { %487 = vperm.xlu1 %1180, %v249_v12   ;;  %477 = vperm.xlu0 %1179, %v247_v13   ;;  %v259_v24 = vld [vmem:[%s1401_s23 + $0x68] sm:$0xff]  ;;  %v258_v25 = vld [vmem:[%s1401_s23 + $0x60] sm:$0xff]  ;;  %v260_v28 = vld [vmem:[%s1401_s23 + $0x70] sm:$0xff] }
  0x1f   : > { %1104 = vmatmul.mubr.msk.f32.gmra.mrb[2].mxu0 %vm266_vm1, %v244_v14  ;;  %v261_v31 = vld [vmem:[%s1401_s23 + $0x78] sm:$0xff] }
  0x20   : > { %1106 = vmatprep.mubr.msk.f32.mxu0 %vm1294_vm0, %v1295_v6 }
  0x22   : > { %497 = vperm.xlu1 %1180, %v251_v15   ;;  %492 = vperm.xlu0 %1179, %v250_v16  }
  0x23   : > { %1107 = vmatmul.mubr.msk.f32.gmra.mrb[4].mxu0 %vm266_vm1, %v245_v17 }
  0x26   : > { %507 = vperm.xlu1 %1180, %v253_v18   ;;  %502 = vperm.xlu0 %1179, %v252_v19  }
  0x2a   : > { %517 = vperm.xlu1 %1180, %v255_v20   ;;  %512 = vperm.xlu0 %1179, %v254_v21  }
  0x2e   : > { %527 = vperm.xlu1 %1180, %v257_v22   ;;  %522 = vperm.xlu0 %1179, %v256_v23  }
  0x32   : > { %537 = vperm.xlu1 %1180, %v259_v24   ;;  %532 = vperm.xlu0 %1179, %v258_v25  }
  0x99   : > { %v473_v34 = vpop.permute.xlu0 %472  ;;  %v483_v35 = vpop.permute.xlu1 %482 }
  0x9d   : > { %v1429_v36 = vpop.permute.xlu0 %477  ;;  %v1431_v40 = vpop.permute.xlu1 %487 }
  0xa1   : > { %v493_v41 = vpop.permute.xlu0 %492  ;;  %v1445_v49 = vpop.permute.xlu1 %497 }
  0xa5   : > { %v503_v52 = vpop.permute.xlu0 %502  ;;  %v508_v54 = vpop.permute.xlu1 %507 }
  0xa9   : > { %v513_v55 = vpop.permute.xlu0 %512  ;;  %v518_v58 = vpop.permute.xlu1 %517 }
  0xad   : > { %v523_v62 = vpop.permute.xlu0 %522  ;;  %v528_v5 = vpop.permute.xlu1 %527 }
  0xb1   : > { %v533_v6 = vpop.permute.xlu0 %532  ;;  %v538_v15 = vpop.permute.xlu1 %537 }
  0xee   : > { %v342_v26 = vpop.f32.mrb[0].mxu0 }
  0xef   : > { %448 = vrot.lane.b32.xlu0 %v342_v26, %s1297_s6  ;;  %v1102_v27 = vpop.f32.mrb[1].mxu0 }
  0xf2   : > { %v347_v29 = vpop.f32.mrb[2].mxu0 }
  0xf3   : > { %542 = vperm.xlu0 %1179, %v260_v28   ;;  %450 = vrot.lane.b32.xlu1 %v347_v29, %s1297_s6  ;;  %v1105_v30 = vpop.f32.mrb[3].mxu0 }
  0xf6   : > { %v352_v32 = vpop.f32.mrb[4].mxu0 }
  0xf7   : > { %759 = vrot.lane.b32.xlu0 %v342_v26, %s1298_s7  ;;  %547 = vperm.xlu1 %1180, %v261_v31   ;;  %v1108_v33 = vpop.f32.mrb[5].mxu0  ;;  %v364_v53 = vrot.slane %v352_v32, %v363_v51  ;;  %v357_v56 = vcombine.high %v352_v32, %v352_v32 }
  0xf9   : > { %v372_v57 = vcombine.high %v364_v53, %v364_v53  ;;  %v371_v59 = vrot.slane %v357_v56, %v363_v51  ;;  %v380_v60 = vrot.slane %v364_v53, %v363_v51 }
  0xfb   : > { %761 = vrot.lane.b32.xlu1 %v347_v29, %s1298_s7  ;;  %v394_v61 = vrot.slane %v372_v57, %v363_v51  ;;  %v387_v63 = vrot.slane %v371_v59, %v363_v51  ;;  %v373_v0 = vcombine.high %v371_v59, %v371_v59  ;;  %v402_v1 = vcombine.high %v380_v60, %v380_v60  ;;  %s991_s7 = sshll.u32 %s232_s30, 4  ;;  %s1649_s7 = int_to_ptr.vmem [resolvable:$true] %s991_s7 }
  0xfc   : > { %v409_v8 = vrot.slane %v380_v60, %v1448_v4  ;;  %s1229_s11 = scalar_lea.vmem %s1649_s7, 128  ;;  %p1236_p0 = scmp.lt.s32.totalorder %s1649_s7, %s1234_s12 }
  0xfd   : > { %v404_v2 = vcombine.high %v394_v61, %v394_v61  ;;  %v403_v3 = vcombine.high %v387_v63, %v387_v63  ;;  %v1450_v7 = vrot.slane %v373_v0, %v363_v51  ;;  %v413_v9 = vrot.slane %v394_v61, %v1448_v4  ;;  %p1230_p11 = scmp.ne.s32.totalorder %s1649_s7, %s1229_s11  ;;  %p1237_p1 = scmp.lt.s32.totalorder %s1235_s13, %s1229_s11 }
  0xfe   : > { %v417_v10 = vrot.slane %v402_v1, %v1448_v4  ;;  %v425_v12 = vrot.slane %v387_v63, %v1448_v4 }
  0xff   : > { %v421_v11 = vrot.slane %v404_v2, %v1448_v4  ;;  %v429_v13 = vrot.slane %v1450_v7, %v1448_v4  ;;  %v433_v14 = vrot.slane %v403_v3, %v1448_v4  ;;  %p1231_p12 = pnand %p1230_p11, %p1369_p5  ;;  %p1238_p2 = por %p1237_p1, %p1236_p0 }
 0x101   : > { %p1232_p13 = pneg %p1231_p12 }
 0x103   : > { %p1239_p3 = pnand %p1238_p2, %p1232_p13 }
 0x161   : > { %v1460_v16 = vpop.permute.xlu0 %448 }
 0x162   : > { %v454_v17 = vmul.f32 %v1460_v16, %v409_v8  ;;  %v456_v18 = vmul.f32 %v1460_v16, %v413_v9  ;;  %v458_v19 = vmul.f32 %v1460_v16, %v417_v10  ;;  %v460_v20 = vmul.f32 %v1460_v16, %v421_v11 }
 0x163   : > { %v462_v21 = vmul.f32 %v1460_v16, %v425_v12  ;;  %v464_v22 = vmul.f32 %v1460_v16, %v429_v13  ;;  %v466_v23 = vmul.f32 %v1460_v16, %v433_v14 }
 0x164   : > { %v1469_v24 = vadd.f32 %v473_v34, %v454_v17  ;;  %v1471_v25 = vadd.f32 %v483_v35, %v456_v18  ;;  %v1473_v26 = vadd.f32 %v493_v41, %v458_v19  ;;  %v1475_v27 = vadd.f32 %v503_v52, %v460_v20 }
 0x165   : > { %v1477_v28 = vadd.f32 %v513_v55, %v462_v21  ;;  %v1479_v29 = vadd.f32 %v523_v62, %v464_v22  ;;  %v1481_v30 = vpop.permute.xlu1 %450  ;;  %v1483_v31 = vadd.f32 %v533_v6, %v466_v23  ;;  %v405_v19 = vcombine.high %v1450_v7, %v1450_v7 }
 0x166   : > { %v567_v32 = vsel %vm566_vm2, %v1469_v24, -inf  ;;  %v576_v33 = vsel %vm566_vm2, %v1471_v25, -inf  ;;  %v585_v34 = vsel %vm566_vm2, %v1473_v26, -inf  ;;  %v594_v35 = vsel %vm566_vm2, %v1475_v27, -inf }
 0x167   : > { %v603_v37 = vsel %vm566_vm2, %v1477_v28, -inf  ;;  %v455_v38 = vmul.f32 %v1481_v30, %v409_v8  ;;  %v457_v39 = vmul.f32 %v1481_v30, %v413_v9  ;;  %v459_v41 = vmul.f32 %v1481_v30, %v417_v10 }
 0x168   : > { %v461_v42 = vmul.f32 %v1481_v30, %v421_v11  ;;  %v463_v43 = vmul.f32 %v1481_v30, %v425_v12  ;;  %v612_v44 = vsel %vm566_vm2, %v1479_v29, -inf  ;;  %v465_v45 = vmul.f32 %v1481_v30, %v429_v13 }
 0x169   : > { %v467_v46 = vmul.f32 %v1481_v30, %v433_v14  ;;  %v1505_v47 = vadd.f32 %v1429_v36, %v455_v38  ;;  %v1508_v48 = vadd.f32 %v1431_v40, %v457_v39  ;;  %v1511_v50 = vadd.f32 %v1445_v49, %v459_v41 }
 0x16a   : > { %v1513_v51 = vadd.f32 %v508_v54, %v461_v42  ;;  %v1515_v52 = vadd.f32 %v518_v58, %v463_v43  ;;  %v621_v53 = vsel %vm566_vm2, %v1483_v31, -inf  ;;  %v1519_v55 = vadd.f32 %v528_v5, %v465_v45 }
 0x16b   : > { %v1521_v56 = vadd.f32 %v538_v15, %v467_v46  ;;  %v568_v36 = vsel %vm566_vm2, %v1505_v47, -inf  ;;  %v577_v40 = vsel %vm566_vm2, %v1508_v48, -inf  ;;  %v586_v49 = vsel %vm566_vm2, %v1511_v50, -inf }
 0x16c   : > { %v569_v57 = vmax.f32 %v567_v32, %v568_v36  ;;  %v595_v54 = vsel %vm566_vm2, %v1513_v51, -inf  ;;  %v578_v58 = vmax.f32 %v576_v33, %v577_v40  ;;  %v587_v59 = vmax.f32 %v585_v34, %v586_v49 }
 0x16d   : > { %v596_v60 = vmax.f32 %v594_v35, %v595_v54  ;;  %v604_v61 = vsel %vm566_vm2, %v1515_v52, -inf  ;;  %v613_v0 = vsel %vm566_vm2, %v1519_v55, -inf  ;;  %v622_v1 = vsel %vm566_vm2, %v1521_v56, -inf }
 0x16e   : > { %v570_v62 = vrot.slane %v569_v57, 4  ;;  %v605_v63 = vmax.f32 %v603_v37, %v604_v61  ;;  %v579_v2 = vrot.slane %v578_v58, 4  ;;  %v588_v5 = vrot.slane %v587_v59, 4 }
 0x16f   : > { %v597_v3 = vrot.slane %v596_v60, 4  ;;  %v614_v6 = vmax.f32 %v612_v44, %v613_v0  ;;  %v623_v10 = vmax.f32 %v621_v53, %v622_v1  ;;  %v437_v53 = vrot.slane %v405_v19, %v1448_v4 }
 0x170   : > { %v571_v8 = vmax.f32 %v569_v57, %v570_v62  ;;  %v606_v9 = vrot.slane %v605_v63, 4  ;;  %v580_v11 = vmax.f32 %v578_v58, %v579_v2  ;;  %v589_v12 = vmax.f32 %v587_v59, %v588_v5 }
 0x171   : > { %v598_v13 = vmax.f32 %v596_v60, %v597_v3  ;;  %v615_v14 = vrot.slane %v614_v6, 4  ;;  %v624_v18 = vrot.slane %v623_v10, 4  ;;  %v468_v0 = vmul.f32 %v1460_v16, %v437_v53 }
 0x172   : > { %v572_v15 = vrot.slane %v571_v8, 2  ;;  %v607_v17 = vmax.f32 %v605_v63, %v606_v9  ;;  %v581_v20 = vrot.slane %v580_v11, 2  ;;  %v590_v21 = vrot.slane %v589_v12, 2  ;;  %v543_v61 = vpop.permute.xlu0 %542 }
 0x173   : > { %v599_v22 = vrot.slane %v598_v13, 2  ;;  %v616_v23 = vmax.f32 %v614_v6, %v615_v14  ;;  %v625_v34 = vmax.f32 %v623_v10, %v624_v18  ;;  %v1547_v6 = vadd.f32 %v543_v61, %v468_v0 }
 0x174   : > { %v573_v32 = vmax.f32 %v571_v8, %v572_v15  ;;  %v608_v33 = vrot.slane %v607_v17, 2  ;;  %v582_v35 = vmax.f32 %v580_v11, %v581_v20  ;;  %v591_v37 = vmax.f32 %v589_v12, %v590_v21 }
 0x175   : > { %v600_v38 = vmax.f32 %v598_v13, %v599_v22  ;;  %v617_v39 = vrot.slane %v616_v23, 2  ;;  %v626_v43 = vrot.slane %v625_v34, 2  ;;  %v630_v13 = vsel %vm566_vm2, %v1547_v6, -inf }
 0x176   : > { %v574_v41 = vrot.slane %v573_v32, 1  ;;  %v609_v42 = vmax.f32 %v607_v17, %v608_v33  ;;  %v583_v44 = vrot.slane %v582_v35, 1  ;;  %v592_v45 = vrot.slane %v591_v37, 1  ;;  %v548_v2 = vpop.permute.xlu1 %547 }
 0x177   : > { %v601_v46 = vrot.slane %v600_v38, 1  ;;  %v618_v36 = vmax.f32 %v616_v23, %v617_v39  ;;  %v627_v58 = vmax.f32 %v625_v34, %v626_v43 }
 0x178   : > { %v575_v7 = vmax.f32 %v573_v32, %v574_v41  ;;  %v584_v57 = vmax.f32 %v582_v35, %v583_v44  ;;  %v593_v40 = vmax.f32 %v591_v37, %v592_v45  ;;  %v610_v49 = vrot.slane %v609_v42, 1 }
 0x179   : > { %v602_v54 = vmax.f32 %v600_v38, %v601_v46  ;;  %v619_v1 = vrot.slane %v618_v36, 1  ;;  %v628_v8 = vrot.slane %v627_v58, 1 }
 0x17a   : > { %v639_v59 = vsub.f32 %v1469_v24, %v575_v7  ;;  %v640_v60 = vsub.f32 %v1505_v47, %v575_v7  ;;  %v641_v62 = vsub.f32 %v1471_v25, %v584_v57  ;;  %v642_v63 = vsub.f32 %v1508_v48, %v584_v57  ;;  %v1567_v41 = vpop.permute.xlu1 %761 }
 0x17b   : > { %v643_v4 = vsub.f32 %v1473_v26, %v593_v40  ;;  %v611_v5 = vmax.f32 %v609_v42, %v610_v49  ;;  %v644_v3 = vsub.f32 %v1511_v50, %v593_v40  ;;  %v469_v24 = vmul.f32 %v1481_v30, %v437_v53 }
 0x17c   : > { %v645_v47 = vsub.f32 %v1475_v27, %v602_v54  ;;  %v655_v9 = vmul.f32 1.442695, %v639_v59  ;;  %v657_v25 = vmul.f32 1.442695, %v640_v60  ;;  %v646_v48 = vsub.f32 %v1513_v51, %v602_v54 }
 0x17d   : > { %v659_v10 = vmul.f32 1.442695, %v641_v62  ;;  %v661_v16 = vmul.f32 1.442695, %v642_v63  ;;  %v1552_v11 = vadd.f32 %v548_v2, %v469_v24  ;;  %v620_v26 = vmax.f32 %v618_v36, %v619_v1 }
 0x17e   : > { %1181 = vpow2.f32 %v655_v9  ;;  %v663_v12 = vmul.f32 1.442695, %v643_v4  ;;  %v665_v50 = vmul.f32 1.442695, %v644_v3  ;;  %v629_v30 = vmax.f32 %v627_v58, %v628_v8 }
 0x17f   : > { %1183 = vpow2.f32 %v657_v25  ;;  %v647_v14 = vsub.f32 %v1477_v28, %v611_v5  ;;  %v667_v27 = vmul.f32 1.442695, %v645_v47  ;;  %v648_v15 = vsub.f32 %v1515_v52, %v611_v5 }
 0x180   : > { %1185 = vpow2.f32 %v659_v10  ;;  %v669_v51 = vmul.f32 1.442695, %v646_v48  ;;  %v631_v17 = vsel %vm566_vm2, %v1552_v11, -inf  ;;  %v649_v18 = vsub.f32 %v1479_v29, %v620_v26  ;;  %v1564_v29 = vpop.permute.xlu0 %759 }
 0x181   : > { %1187 = vpow2.f32 %v661_v16  ;;  %v632_v19 = vmax.f32 %v630_v13, %v631_v17  ;;  %v650_v20 = vsub.f32 %v1519_v55, %v620_v26  ;;  %v671_v21 = vmul.f32 1.442695, %v647_v14 }
 0x182   : > { %1189 = vpow2.f32 %v663_v12  ;;  %v652_v28 = vsub.f32 %v1521_v56, %v629_v30  ;;  %v673_v23 = vmul.f32 1.442695, %v648_v15  ;;  %v675_v52 = vmul.f32 1.442695, %v649_v18 }
 0x183   : > { %1191 = vpow2.f32 %v665_v50  ;;  %v633_v22 = vrot.slane %v632_v19, 4  ;;  %v651_v33 = vsub.f32 %v1483_v31, %v629_v30  ;;  %v677_v34 = vmul.f32 1.442695, %v650_v20 }
 0x184   : > { %1193 = vpow2.f32 %v667_v27  ;;  %v681_v55 = vmul.f32 1.442695, %v652_v28 }
 0x185   : > { %1195 = vpow2.f32 %v669_v51  ;;  %v634_v32 = vmax.f32 %v632_v19, %v633_v22  ;;  %v679_v31 = vmul.f32 1.442695, %v651_v33 }
 0x186   : > { %1197 = vpow2.f32 %v671_v21 }
 0x187   : > { %v635_v37 = vrot.slane %v634_v32, 2  ;;  %1199 = vpow2.f32 %v673_v23 }
 0x188   : > { %v1182_v35 = vpop.eup %1181  ;;  %1201 = vpow2.f32 %v675_v52 }
 0x189   : > { %v1184_v38 = vpop.eup %1183  ;;  %v765_v39 = vmul.f32 %v1182_v35, %v1564_v29  ;;  %v636_v42 = vmax.f32 %v634_v32, %v635_v37  ;;  %1203 = vpow2.f32 %v677_v34  ;;  %v687_v45 = vsel %vm566_vm2, %v1182_v35, 0.0 }
 0x18a   : > { %v1186_v56 = vpop.eup %1185  ;;  %v766_v43 = vmul.f32 %v1184_v38, %v1567_v41  ;;  %v688_v7 = vsel %vm566_vm2, %v1184_v38, 0.0  ;;  %1205 = vpow2.f32 %v681_v55 }
 0x18b   : > { %v1188_v44 = vpop.eup %1187  ;;  %v767_v46 = vmul.f32 %v1186_v56, %v1564_v29  ;;  %v637_v36 = vrot.slane %v636_v42, 1  ;;  %v781_v40 = vsel %vm566_vm2, %v765_v39, 0.0  ;;  %1207 = vpow2.f32 %v679_v31 }
 0x18c   : > { %v1190_v53 = vpop.eup %1189  ;;  %v768_v57 = vmul.f32 %v1188_v44, %v1567_v41  ;;  %v782_v58 = vsel %vm566_vm2, %v766_v43, 0.0  ;;  %v689_v1 = vadd.f32 %v688_v7, %v687_v45  ;;  %v696_v2 = vsel %vm566_vm2, %v1186_v56, 0.0 }
 0x18d   : > { %v1192_v49 = vpop.eup %1191  ;;  %v769_v54 = vmul.f32 %v1190_v53, %v1564_v29  ;;  %v638_v60 = vmax.f32 %v636_v42, %v637_v36  ;;  %v783_v62 = vadd.f32 %v782_v58, %v781_v40  ;;  %v790_v63 = vsel %vm566_vm2, %v767_v46, 0.0 }
 0x18e   : > { %v1194_v59 = vpop.eup %1193  ;;  %v770_v61 = vmul.f32 %v1192_v49, %v1567_v41  ;;  %v791_v4 = vsel %vm566_vm2, %v768_v57, 0.0  ;;  %v697_v8 = vsel %vm566_vm2, %v1188_v44, 0.0  ;;  %v690_v18 = vrot.slane %v689_v1, 4 }
 0x18f   : > { %v1196_v0 = vpop.eup %1195  ;;  %v653_v5 = vsub.f32 %v1547_v6, %v638_v60  ;;  %v654_v3 = vsub.f32 %v1552_v11, %v638_v60  ;;  %v784_v24 = vrot.slane %v783_v62, 4  ;;  %v771_v47 = vmul.f32 %v1194_v59, %v1564_v29 }
 0x190   : > { %v792_v9 = vadd.f32 %v791_v4, %v790_v63  ;;  %v799_v25 = vsel %vm566_vm2, %v769_v54, 0.0  ;;  %v1198_v48 = vpop.eup %1197  ;;  %v772_v26 = vmul.f32 %v1196_v0, %v1567_v41  ;;  %v800_v12 = vsel %vm566_vm2, %v770_v61, 0.0 }
 0x191   : > { %v683_v10 = vmul.f32 1.442695, %v653_v5  ;;  %v685_v16 = vmul.f32 1.442695, %v654_v3  ;;  %v1200_v50 = vpop.eup %1199  ;;  %v698_v6 = vadd.f32 %v697_v8, %v696_v2  ;;  %v785_v11 = vadd.f32 %v784_v24, %v783_v62 }
 0x192   : > { %v1202_v13 = vpop.eup %1201  ;;  %v773_v14 = vmul.f32 %v1198_v48, %v1564_v29  ;;  %v793_v27 = vrot.slane %v792_v9, 4  ;;  %v1589_v15 = vadd.f32 %v800_v12, %v799_v25  ;;  %v808_v51 = vsel %vm566_vm2, %v771_v47, 0.0 }
 0x193   : > { %1209 = vpow2.f32 %v683_v10  ;;  %v1204_v30 = vpop.eup %1203  ;;  %v809_v17 = vsel %vm566_vm2, %v772_v26, 0.0  ;;  %v706_v20 = vsel %vm566_vm2, %v1192_v49, 0.0  ;;  %v774_v21 = vmul.f32 %v1200_v50, %v1567_v41 }
 0x194   : > { %1211 = vpow2.f32 %v685_v16  ;;  %v1206_v19 = vpop.eup %1205  ;;  %v775_v22 = vmul.f32 %v1202_v13, %v1564_v29  ;;  %v776_v28 = vmul.f32 %v1204_v30, %v1567_v41  ;;  %v786_v23 = vrot.slane %v785_v11, 2 }
 0x195   : > { %v699_v52 = vrot.slane %v698_v6, 4  ;;  %v1208_v32 = vpop.eup %1207  ;;  %v1597_v33 = vadd.f32 %v793_v27, %v792_v9  ;;  %v802_v34 = vrot.slane %v1589_v15, 4  ;;  %v1600_v35 = vadd.f32 %v809_v17, %v808_v51 }
 0x196   : > { %v817_v37 = vsel %vm566_vm2, %v773_v14, 0.0  ;;  %v1604_v38 = vmul.f32 %v1206_v19, %v1567_v41  ;;  %v691_v55 = vadd.f32 %v690_v18, %v689_v1  ;;  %v705_v39 = vsel %vm566_vm2, %v1190_v53, 0.0 }
 0x197   : > { %v714_v56 = vsel %vm566_vm2, %v1194_v59, 0.0  ;;  %v707_v42 = vadd.f32 %v706_v20, %v705_v39  ;;  %v715_v43 = vsel %vm566_vm2, %v1196_v0, 0.0  ;;  %v723_v44 = vsel %vm566_vm2, %v1198_v48, 0.0 }
 0x198   : > { %v724_v31 = vsel %vm566_vm2, %v1200_v50, 0.0  ;;  %v1611_v45 = vadd.f32 %v786_v23, %v785_v11  ;;  %v700_v46 = vadd.f32 %v699_v52, %v698_v6  ;;  %v716_v7 = vadd.f32 %v715_v43, %v714_v56 }
 0x199   : > { %v725_v36 = vadd.f32 %v724_v31, %v723_v44  ;;  %v818_v57 = vsel %vm566_vm2, %v774_v21, 0.0  ;;  %v708_v40 = vrot.slane %v707_v42, 4  ;;  %v732_v49 = vsel %vm566_vm2, %v1202_v13, 0.0 }
 0x19a   : > { %v733_v53 = vsel %vm566_vm2, %v1204_v30, 0.0  ;;  %v692_v58 = vrot.slane %v691_v55, 2  ;;  %v717_v59 = vrot.slane %v716_v7, 4  ;;  %v741_v61 = vsel %vm566_vm2, %v1208_v32, 0.0 }
 0x19b   : > { %v726_v60 = vrot.slane %v725_v36, 4  ;;  %v709_v0 = vadd.f32 %v708_v40, %v707_v42  ;;  %v734_v1 = vadd.f32 %v733_v53, %v732_v49  ;;  %v742_v4 = vsel %vm566_vm2, %v1206_v19, 0.0 }
 0x19c   : > { %v811_v5 = vrot.slane %v1600_v35, 4  ;;  %v819_v3 = vadd.f32 %v818_v57, %v817_v37  ;;  %v701_v24 = vrot.slane %v700_v46, 2  ;;  %v718_v9 = vadd.f32 %v717_v59, %v716_v7 }
 0x19d   : > { %v1210_v54 = vpop.eup %1209  ;;  %v710_v47 = vrot.slane %v709_v0, 2  ;;  %v727_v25 = vadd.f32 %v726_v60, %v725_v36  ;;  %v826_v48 = vsel %vm566_vm2, %v775_v22, 0.0  ;;  %v827_v10 = vsel %vm566_vm2, %v776_v28, 0.0 }
 0x19e   : > { %v1212_v62 = vpop.eup %1211  ;;  %v750_v63 = vsel %vm566_vm2, %v1210_v54, 0.0  ;;  %v735_v16 = vrot.slane %v734_v1, 4  ;;  %v743_v26 = vadd.f32 %v742_v4, %v741_v61  ;;  %v693_v50 = vadd.f32 %v692_v58, %v691_v55 }
 0x19f   : > { %v751_v2 = vsel %vm566_vm2, %v1212_v62, 0.0  ;;  %v719_v13 = vrot.slane %v718_v9, 2  ;;  %v728_v6 = vrot.slane %v727_v25, 2  ;;  %v702_v11 = vadd.f32 %v701_v24, %v700_v46 }
 0x1a0   : > { %v752_v8 = vadd.f32 %v751_v2, %v750_v63  ;;  %v711_v30 = vadd.f32 %v710_v47, %v709_v0  ;;  %v736_v14 = vadd.f32 %v735_v16, %v734_v1  ;;  %v744_v27 = vrot.slane %v743_v26, 4 }
 0x1a1   : > { %v795_v17 = vrot.slane %v1597_v33, 2  ;;  %v803_v18 = vadd.f32 %v802_v34, %v1589_v15  ;;  %v720_v19 = vadd.f32 %v719_v13, %v718_v9  ;;  %v820_v20 = vrot.slane %v819_v3, 4 }
 0x1a2   : > { %v753_v12 = vrot.slane %v752_v8, 4  ;;  %v729_v21 = vadd.f32 %v728_v6, %v727_v25  ;;  %v737_v22 = vrot.slane %v736_v14, 2  ;;  %v745_v28 = vadd.f32 %v744_v27, %v743_v26 }
 0x1a3   : > { %v828_v52 = vadd.f32 %v827_v10, %v826_v48  ;;  %v694_v37 = vrot.slane %v693_v50, 1  ;;  %v777_v55 = vmul.f32 %v1208_v32, %v1564_v29  ;;  %v703_v39 = vrot.slane %v702_v11, 1 }
 0x1a4   : > { %v754_v51 = vadd.f32 %v753_v12, %v752_v8  ;;  %v712_v56 = vrot.slane %v711_v30, 1  ;;  %v738_v42 = vadd.f32 %v737_v22, %v736_v14  ;;  %v746_v43 = vrot.slane %v745_v28, 2 }
 0x1a5   : > { %v780_v44 = vmul.f32 %v1212_v62, %v1567_v41  ;;  %v796_v31 = vadd.f32 %v795_v17, %v1597_v33  ;;  %v812_v15 = vadd.f32 %v811_v5, %v1600_v35  ;;  %v721_v34 = vrot.slane %v720_v19, 1 }
 0x1a6   : > { %v755_v23 = vrot.slane %v754_v51, 2  ;;  %v730_v7 = vrot.slane %v729_v21, 1  ;;  %v747_v36 = vadd.f32 %v746_v43, %v745_v28  ;;  %v779_v57 = vmul.f32 %v1210_v54, %v1564_v29 }
 0x1a7   : > { %v695_v40 = vadd.f32 %v694_v37, %v693_v50  ;;  %v739_v49 = vrot.slane %v738_v42, 1  ;;  %v829_v53 = vrot.slane %v828_v52, 4  ;;  %v835_v32 = vsel %vm566_vm2, %v777_v55, 0.0 }
 0x1a8   : > { %v756_v46 = vadd.f32 %v755_v23, %v754_v51  ;;  %v804_v58 = vrot.slane %v803_v18, 2  ;;  %v704_v59 = vadd.f32 %v703_v39, %v702_v11  ;;  %v713_v60 = vadd.f32 %v712_v56, %v711_v30 }
 0x1a9   : > { %v821_v61 = vadd.f32 %v820_v20, %v819_v3  ;;  %v722_v41 = vadd.f32 %v721_v34, %v720_v19  ;;  %v748_v62 = vrot.slane %v747_v36, 1  ;;  %v830_v33 = vadd.f32 %v829_v53, %v828_v52 }
 0x1aa   : > { %v836_v35 = vsel %vm566_vm2, %v1604_v38, 0.0  ;;  %v731_v63 = vadd.f32 %v730_v7, %v729_v21  ;;  %v757_v0 = vrot.slane %v756_v46, 1  ;;  %v844_v29 = vsel %vm566_vm2, %v779_v57, 0.0 }
 0x1ab   : > { %v837_v1 = vadd.f32 %v836_v35, %v835_v32  ;;  %v740_v54 = vadd.f32 %v739_v49, %v738_v42  ;;  %v813_v4 = vrot.slane %v812_v15, 2  ;;  %v845_v2 = vsel %vm566_vm2, %v780_v44, 0.0 }
 0x1ac   : > { %1213 = vrcp.f32 %v695_v40  ;;  %v822_v5 = vrot.slane %v821_v61, 2  ;;  %v846_v8 = vadd.f32 %v845_v2, %v844_v29  ;;  %v749_v3 = vadd.f32 %v748_v62, %v747_v36 }
 0x1ad   : > { %v838_v24 = vrot.slane %v837_v1, 4  ;;  %1215 = vrcp.f32 %v704_v59  ;;  %v805_v47 = vadd.f32 %v804_v58, %v803_v18  ;;  %v831_v9 = vrot.slane %v830_v33, 2 }
 0x1ae   : > { %1217 = vrcp.f32 %v713_v60  ;;  %v758_v25 = vadd.f32 %v757_v0, %v756_v46  ;;  %v847_v48 = vrot.slane %v846_v8, 4  ;;  %v788_v10 = vrot.slane %v1611_v45, 1 }
 0x1af   : > { %v839_v38 = vadd.f32 %v838_v24, %v837_v1  ;;  %1219 = vrcp.f32 %v722_v41  ;;  %v814_v16 = vadd.f32 %v813_v4, %v812_v15  ;;  %v823_v26 = vadd.f32 %v822_v5, %v821_v61 }
 0x1b0   : > { %1221 = vrcp.f32 %v731_v63  ;;  %v848_v50 = vadd.f32 %v847_v48, %v846_v8  ;;  %v797_v13 = vrot.slane %v796_v31, 1  ;;  %v832_v6 = vadd.f32 %v831_v9, %v830_v33  ;;  %v1073_v63 = vld [vmem:[%s1694_s4] ss:$0 sm:$0xff] }
 0x1b1   : > { %v840_v12 = vrot.slane %v839_v38, 2  ;;  %1223 = vrcp.f32 %v740_v54  ;;  %v806_v11 = vrot.slane %v805_v47, 1  ;;  %v815_v27 = vrot.slane %v814_v16, 1 }
 0x1b2   : > { %1225 = vrcp.f32 %v749_v3  ;;  %v849_v14 = vrot.slane %v848_v50, 2  ;;  %v789_v51 = vadd.f32 %v788_v10, %v1611_v45  ;;  %v824_v17 = vrot.slane %v823_v26, 1 }
 0x1b3   : > { %v841_v30 = vadd.f32 %v840_v12, %v839_v38  ;;  %1227 = vrcp.f32 %v758_v25  ;;  %v798_v20 = vadd.f32 %v797_v13, %v796_v31  ;;  %v833_v21 = vrot.slane %v832_v6, 1 }
 0x1b4   : > { %v850_v18 = vadd.f32 %v849_v14, %v848_v50  ;;  %v807_v28 = vadd.f32 %v806_v11, %v805_v47  ;;  %v816_v55 = vadd.f32 %v815_v27, %v814_v16  ;;  %v825_v43 = vadd.f32 %v824_v17, %v823_v26 }
 0x1b5   : > { %v842_v23 = vrot.slane %v841_v30, 1  ;;  %v834_v15 = vadd.f32 %v833_v21, %v832_v6 }
 0x1b6   : > { %v1214_v19 = vpop.eup %1213  ;;  %v851_v39 = vrot.slane %v850_v18, 1 }
 0x1b7   : > { %v1216_v22 = vpop.eup %1215  ;;  %v861_v52 = vmul.f32 %v1214_v19, %v789_v51  ;;  %v843_v7 = vadd.f32 %v842_v23, %v841_v30 }
 0x1b8   : > { %v1218_v37 = vpop.eup %1217  ;;  %v862_v56 = vmul.f32 %v1216_v22, %v798_v20  ;;  %v852_v49 = vadd.f32 %v851_v39, %v850_v18 }
 0x1b9   : > { %v1220_v42 = vpop.eup %1219  ;;  %v863_v44 = vmul.f32 %v1218_v37, %v807_v28 }
 0x1ba   : > { %v1222_v45 = vpop.eup %1221  ;;  %v864_v34 = vmul.f32 %v1220_v42, %v816_v55  ;;  %v889_v46 = vsel %vm888_vm3, %v862_v56, %v861_v52 }
 0x1bb   : > { %v1224_v31 = vpop.eup %1223  ;;  %v865_v36 = vmul.f32 %v1222_v45, %v825_v43  ;;  %v891_v57 = vsel %vm890_vm4, %v863_v44, %v889_v46 }
 0x1bc   : > { %v1226_v40 = vpop.eup %1225  ;;  %v866_v53 = vmul.f32 %v1224_v31, %v834_v15  ;;  %v893_v32 = vsel %vm892_vm5, %v864_v34, %v891_v57 }
 0x1bd   : > { %v1228_v58 = vpop.eup %1227  ;;  %v867_v59 = vmul.f32 %v1226_v40, %v843_v7  ;;  %v895_v60 = vsel %vm894_vm6, %v865_v36, %v893_v32 }
 0x1be   : > { %v868_v61 = vmul.f32 %v1228_v58, %v852_v49  ;;  %v897_v41 = vsel %vm896_vm7, %v866_v53, %v895_v60 }
 0x1bf   : > { %v899_v62 = vsel %vm898_vm8, %v867_v59, %v897_v41 }
 0x1c0   : > { %v901_v33 = vsel %vm900_vm9, %v868_v61, %v899_v62 }
 0x1c1   : > { %902 = vrot.lane.b32.xlu0 %v901_v33, %s1297_s6  ;;  %s1647_s6 = scalar_lea.hbm %s1695_s5, %s1076_s26 }
 0x233   : > { %v903_v35 = vpop.permute.xlu0 %902 }
 0x234   : > { %1118 = vmatmul.mubr.msk.f32.vlgmr.msra.gmra.mrb[0].mxu1 %vm266_vm1, %v903_v35 }
 0x307   : > { %v972_v0 = vpop.f32.mrb[0].mxu1 }
 0x308   : > { %v973_v1 = vadd.f32 %v1073_v63, %v972_v0  ;;  %v1119_v29 = vpop.f32.mrb[1].mxu1 }
 0x30a   : > { %976 = vst.msk [vmem:[%s232_s30] sm:$0xff] %vm266_vm1, %v973_v1 }
 0x30b   : > { %1242 = shalt.err (!%p1239_p3)
}
 0x30c   : > { %s1243_s14 = scalar_lea.hbm %s1647_s6, 128  ;;  %s1247_s17 = scalar_lea.hbm %s1695_s5, 256 }
 0x30d   : > { %p1244_p4 = scmp.ne.s32.totalorder %s1647_s6, %s1243_s14  ;;  %p1248_p9 = scmp.lt.u32.totalorder %s1647_s6, %s1695_s5 }
 0x30e   : > { %p1249_p10 = scmp.lt.u32.totalorder %s1247_s17, %s1243_s14  ;;  %p1251_p12 = scmp.lt.u32.totalorder %s1243_s14, %s1647_s6 }
 0x30f   : > { %p1245_p7 = pnand %p1244_p4, %p1369_p5 }
 0x310   : > { %p1250_p11 = por %p1249_p10, %p1248_p9 }
 0x311   : > { %p1246_p8 = pneg %p1245_p7 }
 0x312   : > { %p1252_p13 = por %p1251_p12, %p1250_p11 }
 0x314   : > { %p1253_p0 = pnand %p1252_p13, %p1246_p8 }
 0x316   : > { %1256 = shalt.err (!%p1253_p0)
}
 0x317   : > { %1133 = dma.vmem_to_hbm [thread:$0]  (%p1369_p5), %s1649_s7, 128, %s1647_s6, %s978_s10  }
 0x318 PF: > { %p1139_p1 = scmp.ge.s32.totalorder %s1291_s21, 2  ;;  %s1003_s26 = sand.u32 1, %s1279_s18  }
 0x319   : > { %s1004_s30 = scalar_lea.sflag [#allocation3], %s1003_s26 }
 0x31a   : > { %p1136_p2 = pnand %p1139_p1, %p1373_p6 }
 0x31c   : > { %1274 = dma.done.wait (!%p1136_p2), %s1004_s30, 128  }
 0x31d   : > { %1276 = vsyncadd (!%p1136_p2), %s1004_s30, 4294967168  ;;  %p15_p3 = scmp.ge.s32.totalorder %s1356_s24, 4   ;;  %s1698_s18 = smov %s1283_s19 }
 0x31e   : > { %s1699_s19 = smov %s1287_s20  ;;  %s1700_s20 = smov %s1367_s27 }
 0x31f   : > { %s1701_s21 = smov %s1356_s24  ;;  %17 = sbr.rel (!%p15_p3) target bundleno = 3 (0x3), region = 78 }
 0x326   :  { %1009 = vsyncpa [#allocation3], 1 }
 0x327   :  { %1011 = vsyncpa [#allocation3 + $0x1], 1 }

</bundles_post_ra>
